<compile_context>
chip_gen: v6e
topology: v6e:2x2x1
jax: 0.10.0
libtpu: 0.0.40
codegen_flags: <defaults>
</compile_context>

<pallas_src>
import math

import jax
import jax.numpy as jnp
from jax.experimental import pallas as pl
from jax.experimental.pallas import tpu as pltpu


def _pad_to_mult9_kernel(x_ref, o_ref):
    """Write each output tile exactly once: bulk copy of the flattened rows,
    plus one small (<9 column) store zeroing the pad tail.

    A single fused full-width store (value-level pad/concat of the tile) was
    considered per the perf review, but `cur` is generally not lane-aligned
    and lane-dim pad/concat is not a guaranteed Mosaic lowering; the two
    disjoint stores below are proven to compile on all generations and only
    re-touch a single boundary vreg group.
    """
    cur = x_ref.shape[-1]        # static: H*W
    target = o_ref.shape[-1]     # static: ceil(H*W / 9) * 9
    o_ref[:, :cur] = x_ref[...]
    if target > cur:             # static guard; no store when already aligned
        o_ref[:, cur:] = jnp.zeros((o_ref.shape[0], target - cur), o_ref.dtype)


def _vmem_capacity_bytes():
    """Per-core VMEM capacity; falls back to the v7x figure (safe everywhere)."""
    try:
        cap = getattr(pltpu.get_tpu_info(), "vmem_capacity_bytes", None)
        if cap:
            return int(cap)
    except Exception:
        pass
    return 64 * 1024 * 1024


def _row_tiling(rows, cur, target, itemsize, budget_bytes):
    """Pick (tile_r, num_steps): largest tile fitting the double-buffered
    VMEM budget, rebalanced so every grid step carries ~equal rows and there
    are at least two (even) steps so both of v7x's TensorCores get work."""
    sub = {1: 32, 2: 16, 4: 8}.get(itemsize, 8)     # sublane packing multiple
    bytes_per_row = (cur + target) * itemsize * 2   # in+out, double-buffered
    max_tile = max(sub, budget_bytes // max(bytes_per_row, 1))

    num_tiles = pl.cdiv(rows, max_tile)
    if rows >= 2 * sub:
        if num_tiles < 2:
            num_tiles = 2          # guarantee work for a second TensorCore
        elif num_tiles % 2:
            num_tiles += 1         # even split across the two TCs
    tile_r = pl.cdiv(rows, num_tiles)
    tile_r = max(sub, ((tile_r + sub - 1) // sub) * sub)
    if tile_r >= rows:
        tile_r = rows              # single full-extent block (alignment-exempt)
    return tile_r, pl.cdiv(rows, tile_r)


def _pallas_pad_rows(flat, target):
    """flat: (rows, cur) -> (rows, target) with zero padding, via Pallas."""
    rows, cur = flat.shape
    itemsize = jnp.dtype(flat.dtype).itemsize

    vmem_cap = _vmem_capacity_bytes()
    # ~40% of VMEM (capped at 48 MiB) for the pipelined tiles leaves headroom
    # for compiler scratch: v7x -> ~25.6 MiB of 64 MiB, v5e/v6e -> 48 of 128.
    budget = min(48 * 1024 * 1024, (vmem_cap * 2) // 5)
    vmem_limit = min(64 * 1024 * 1024, (vmem_cap * 3) // 4)

    tile_r, num_steps = _row_tiling(rows, cur, target, itemsize, budget)

    return pl.pallas_call(
        _pad_to_mult9_kernel,
        out_shape=jax.ShapeDtypeStruct((rows, target), flat.dtype),
        grid=(num_steps,),
        # Intentional: last dims are full-extent (cur / target) so every DMA
        # is one contiguous burst; only the row tile needs sublane alignment.
        in_specs=[pl.BlockSpec((tile_r, cur), lambda i: (i, 0))],
        out_specs=pl.BlockSpec((tile_r, target), lambda i: (i, 0)),
        compiler_params=pltpu.CompilerParams(
            dimension_semantics=("parallel",),   # shard rows over v7x's 2 TCs
            vmem_limit_bytes=vmem_limit,
        ),
        cost_estimate=pl.CostEstimate(
            flops=0,
            transcendentals=0,
            bytes_accessed=rows * (cur + target) * itemsize,
        ),
    )(flat)


def flatten_and_pad_to_multiple_of_nine(x, *, use_pallas=None):
    B, C, H, W = x.shape
    cur = H * W
    target = math.ceil(cur / 9) * 9
    rows = B * C

    # Glue: flatten (B, C, H, W) -> (B*C, H*W) so lanes map to the last dim.
    flat = x.reshape(rows, cur)

    if use_pallas is None:
        # Pure data movement: below ~4 MiB of output, XLA's fused pad wins
        # over pallas_call launch + pipeline prologue/epilogue overhead.
        use_pallas = rows * target * jnp.dtype(x.dtype).itemsize >= (4 << 20)

    if use_pallas:
        padded = _pallas_pad_rows(flat, target)
    else:
        padded = jnp.pad(flat, ((0, 0), (0, target - cur)))

    out = padded.reshape(B, C, target)
    # PyTorch's .squeeze() removes every size-1 dimension.
    return jnp.squeeze(out)


def _reference(x):
    """Pure-JAX reference mirroring the PyTorch forward."""
    B, C, H, W = x.shape
    cur = H * W
    target = math.ceil(cur / 9) * 9
    flat = x.reshape(B, C, cur)
    padded = jnp.pad(flat, ((0, 0), (0, 0), (0, target - cur)))
    return jnp.squeeze(padded)


if __name__ == "__main__":
    key = jax.random.PRNGKey(0)

    # Primary test: small shape consistent with the module; force the Pallas
    # path so the kernel itself runs (the auto heuristic would use jnp.pad).
    B, C, H, W = 2, 4, 16, 16
    x = jax.random.normal(key, (B, C, H, W), dtype=jnp.float32)

    out = jax.block_until_ready(
        flatten_and_pad_to_multiple_of_nine(x, use_pallas=True))
    ref = _reference(x)
    assert out.shape == ref.shape, (out.shape, ref.shape)
    assert out.dtype == ref.dtype, (out.dtype, ref.dtype)
    assert jnp.allclose(out, ref), "mismatch vs reference (16x16)"

    # H*W not lane-aligned (17*17=289 -> pad to 297): exercises the tail store.
    x2 = jax.random.normal(jax.random.PRNGKey(1), (2, 4, 17, 17), jnp.float32)
    out2 = jax.block_until_ready(
        flatten_and_pad_to_multiple_of_nine(x2, use_pallas=True))
    ref2 = _reference(x2)
    assert out2.shape == ref2.shape, (out2.shape, ref2.shape)
    assert jnp.allclose(out2, ref2), "mismatch vs reference (17x17)"

    # Multi-step grid with a ragged (masked) last row-block: rows = 3*33 = 99
    # -> forced to 2 balanced steps (56 + 43 rows).
    x3 = jax.random.normal(jax.random.PRNGKey(2), (3, 33, 16, 16), jnp.float32)
    out3 = jax.block_until_ready(
        flatten_and_pad_to_multiple_of_nine(x3, use_pallas=True))
    ref3 = _reference(x3)
    assert out3.shape == ref3.shape, (out3.shape, ref3.shape)
    assert jnp.allclose(out3, ref3), "mismatch vs reference (multi-tile)"

    print("KERNEL_OK")
</pallas_src>

<mosaic_0001>
module attributes {stable_mosaic.version = 11 : i64} {
  func.func @_pad_to_mult9_kernel(%arg0: i32, %arg1: memref<8x256xf32, #tpu.memory_space<vmem>>, %arg2: memref<8x261xf32, #tpu.memory_space<vmem>>) attributes {dimension_semantics = [#tpu.dimension_semantics<parallel>], iteration_bounds = array<i64: 1>, scalar_prefetch = 0 : i64, scratch_operands = 0 : i64, tpu.core_type = #tpu.core_type<tc>, window_params = [{transform_indices = @transform_0, window_bounds = array<i64: 8, 256>}, {transform_indices = @transform_1, window_bounds = array<i64: 8, 261>}]} {
    %c0 = arith.constant 0 : index
    %c0_0 = arith.constant 0 : index
    %0 = vector.load %arg1[%c0, %c0_0] : memref<8x256xf32, #tpu.memory_space<vmem>>, vector<8x256xf32>
    %c0_1 = arith.constant 0 : index
    %c0_2 = arith.constant 0 : index
    %1 = vector.load %arg2[%c0_1, %c0_2] : memref<8x261xf32, #tpu.memory_space<vmem>>, vector<8x256xf32>
    tpu.vector_store %arg2[%c0_1, %c0_2], %0 {strides = array<i32>} : memref<8x261xf32, #tpu.memory_space<vmem>>, vector<8x256xf32>,
    %cst = arith.constant 0.000000e+00 : f32
    %2 = vector.broadcast %cst : f32 to vector<8x5xf32>
    %c0_3 = arith.constant 0 : index
    %c256 = arith.constant 256 : index
    %3 = vector.load %arg2[%c0_3, %c256] : memref<8x261xf32, #tpu.memory_space<vmem>>, vector<8x5xf32>
    tpu.vector_store %arg2[%c0_3, %c256], %2 {strides = array<i32>} : memref<8x261xf32, #tpu.memory_space<vmem>>, vector<8x5xf32>,
    return
  }
  func.func @transform_0(%arg0: i32) -> (i32, i32) {
    %c0_i32 = arith.constant 0 : i32
    %c0_i32_0 = arith.constant 0 : i32
    return %arg0, %c0_i32 : i32, i32
  }
  func.func @transform_1(%arg0: i32) -> (i32, i32) {
    %c0_i32 = arith.constant 0 : i32
    %c0_i32_0 = arith.constant 0 : i32
    return %arg0, %c0_i32 : i32, i32
  }
}

</mosaic_0001>

<bundles_post_ra>
// kernel: tpu_custom_call.1
= control target key start
LH: loop header
LB: loop body
LE: loop exit
PB: predicated region body
PF: predicated region fallthrough
CT: control target
= control target key end

     0   :  { %6 = vsyncpa [#allocation3], 0  ;;  %s108_s0 = inlined_call_operand.hbm [shape: f32[8,256], index: 0, kind: input, shape index: {}]   ;;  %s109_s1 = inlined_call_operand.hbm [shape: f32[8,261], index: 1, kind: output, shape index: {}]  }
   0x1   :  { %7 = vsyncpa [#allocation4], 0  ;;  %s89_s6 = smov [#allocation2]  }
   0x2   :  { %s14_s7 = sshll.u32 %s89_s6, 4  ;;  %s15_s7 = int_to_ptr.vmem [resolvable:$true] %s14_s7 }
   0x3   :  { %s53_s8 = scalar_lea.vmem %s15_s7, 256  ;;  %p58_p1 = scmp.lt.s32.totalorder %s15_s7, %s15_s7 }
   0x4   :  { %p54_p0 = scmp.ne.s32.totalorder %s15_s7, %s53_s8  ;;  %p59_p2 = scmp.lt.s32.totalorder %s53_s8, %s53_s8 }
   0x6   :  { %p60_p3 = por %p59_p2, %p58_p1 }
   0x8   :  { %p61_p4 = pnand %p60_p3, %p54_p0 }
   0xa   :  { %64 = shalt.err (!%p61_p4)
}
   0xb   :  { %17 = dma.hbm_to_vmem [thread:$0]  %s108_s0, 256, %s15_s7, [#allocation3]  }
   0xc   :  { %85 = dma.done.wait [#allocation3], 256  }
   0xd   :  { %86 = vsyncadd [#allocation3], 4294967040  ;;  %vm25_vm0 = vcmask 39936   ;;  %v90_v0 = vmov 0.0   ;;  %s91_s11 = smov [#allocation5]   ;;  %v21_v1 = vld [vmem:[#allocation2] sm:$0xff] }
   0xe   :  { %26 = vst.msk [vmem:[#allocation5 + $0x10] sm:$0xff] %vm25_vm0, %v90_v0  ;;  %s33_s12 = sshll.u32 %s91_s11, 4  ;;  %v22_v2 = vld [vmem:[#allocation2 + $0x8] sm:$0xff]  ;;  %23 = vst [vmem:[#allocation5] sm:$0xff] %v21_v1  ;;  %s34_s12 = int_to_ptr.vmem [resolvable:$true] %s33_s12 }
   0xf   :  { %24 = vst [vmem:[#allocation5 + $0x8] sm:$0xff] %v22_v2  ;;  %s65_s13 = scalar_lea.vmem %s34_s12, 384  ;;  %p70_p6 = scmp.lt.s32.totalorder %s34_s12, %s34_s12 }
  0x10   :  { %p66_p5 = scmp.ne.s32.totalorder %s34_s12, %s65_s13  ;;  %p71_p7 = scmp.lt.s32.totalorder %s65_s13, %s65_s13 }
  0x12   :  { %p72_p8 = por %p71_p7, %p70_p6 }
  0x14   :  { %p73_p9 = pnand %p72_p8, %p66_p5 }
  0x16   :  { %76 = shalt.err (!%p73_p9)
}
  0x17   :  { %36 = dma.vmem_to_hbm [thread:$0]  %s34_s12, 384, %s109_s1, [#allocation4]  }
  0x18   :  { %87 = dma.done.wait [#allocation4], 384  }
  0x19   :  { %88 = vsyncadd [#allocation4], 4294966912 }
  0x1a   :  { %40 = vsyncpa [#allocation3], 1 }
  0x1b   :  { %41 = vsyncpa [#allocation4], 1 }

</bundles_post_ra>
